<compile_context>
chip_gen: v5e
topology: v5e:2x2
jax: 0.10.0
libtpu: 0.0.40
codegen_flags: <defaults>
</compile_context>

<pallas_src>
import numpy as np

import jax
import jax.numpy as jnp
from jax.experimental import pallas as pl
from jax.experimental.pallas import tpu as pltpu


# ----------------------------------------------------------------------------
# Host-side helpers (tiny, run once per call): output size + interpolation mats
# ----------------------------------------------------------------------------

def _resized_hw(h, w, size):
    """torchvision F.resize(int) semantics: smaller edge -> size, keep aspect."""
    if h <= w:
        return size, int(size * w / h)
    return int(size * h / w), size


def _bilinear_matrix(out_len, in_len):
    """(out_len, in_len) row-stochastic bilinear interp matrix (align_corners=False)."""
    out_idx = np.arange(out_len)
    scale = in_len / out_len
    src = np.clip((out_idx + 0.5) * scale - 0.5, 0.0, in_len - 1)
    lo = np.floor(src).astype(np.int64)
    hi = np.minimum(lo + 1, in_len - 1)
    w_hi = (src - lo).astype(np.float32)
    w_lo = (1.0 - w_hi).astype(np.float32)
    mat = np.zeros((out_len, in_len), dtype=np.float32)
    mat[out_idx, lo] += w_lo
    mat[out_idx, hi] += w_hi
    return jnp.asarray(mat)


def _nearest_matrix(out_len, in_len):
    """(out_len, in_len) one-hot nearest-neighbor matrix (PyTorch 'nearest' rule)."""
    src = np.minimum((np.arange(out_len) * in_len) // out_len, in_len - 1)
    mat = np.zeros((out_len, in_len), dtype=np.float32)
    mat[np.arange(out_len), src] = 1.0
    return jnp.asarray(mat)


# ----------------------------------------------------------------------------
# Pallas kernels
# ----------------------------------------------------------------------------

def _bilinear_resize_kernel(wh_ref, wwt_ref, x_ref, o_ref):
    # x_ref: (H_in, W_in) plane; wh_ref: (H_out, H_in); wwt_ref: (W_in, W_out)
    x = x_ref[...].astype(jnp.float32)
    t = jnp.dot(wh_ref[...], x, preferred_element_type=jnp.float32)       # (H_out, W_in)
    y = jnp.dot(t, wwt_ref[...], preferred_element_type=jnp.float32)      # (H_out, W_out)
    o_ref[...] = y.astype(o_ref.dtype)


def _nearest_threshold_kernel(sh_ref, swt_ref, m_ref, o_ref):
    # nearest resize via one-hot matmuls, then (mask > 0.5).float()
    m = m_ref[...].astype(jnp.float32)
    t = jnp.dot(sh_ref[...], m, preferred_element_type=jnp.float32)
    y = jnp.dot(t, swt_ref[...], preferred_element_type=jnp.float32)
    o_ref[...] = jnp.where(y > jnp.float32(0.5), 1.0, 0.0).astype(o_ref.dtype)


def _resize_pallas(img, out_hw, row_mat, col_mat_t, kernel, out_dtype):
    C, H, W = img.shape
    H2, W2 = out_hw
    return pl.pallas_call(
        kernel,
        out_shape=jax.ShapeDtypeStruct((C, H2, W2), out_dtype),
        grid_spec=pltpu.PrefetchScalarGridSpec(
            num_scalar_prefetch=0,
            grid=(C,),  # one full lane-dense output plane per grid step
            in_specs=[
                # Interp matrices: constant block index -> stay VMEM-resident.
                pl.BlockSpec((H2, H), lambda c: (0, 0)),
                pl.BlockSpec((W, W2), lambda c: (0, 0)),
                # One channel plane per step; last two block dims == full array dims.
                pl.BlockSpec((pl.Squeezed(), H, W), lambda c: (c, 0, 0)),
            ],
            out_specs=pl.BlockSpec((pl.Squeezed(), H2, W2), lambda c: (c, 0, 0)),
        ),
        compiler_params=pltpu.CompilerParams(
            dimension_semantics=("parallel",),  # v7x: shard planes across 2 TCs
        ),
    )(row_mat, col_mat_t, img)


def pallas_resize_bilinear(img, size):
    """F.resize(img, size) equivalent for a (C, H, W) array (bilinear)."""
    C, H, W = img.shape
    H2, W2 = _resized_hw(H, W, size)
    wh = _bilinear_matrix(H2, H)                       # (H2, H)
    wwt = jnp.transpose(_bilinear_matrix(W2, W))       # (W, W2)
    return _resize_pallas(img, (H2, W2), wh, wwt, _bilinear_resize_kernel, img.dtype)


def pallas_resize_nearest_threshold(mask, size):
    """F.resize(mask, size, NEAREST) followed by (mask > 0.5).float()."""
    squeeze = mask.ndim == 2
    if squeeze:
        mask = mask[None]
    C, H, W = mask.shape
    H2, W2 = _resized_hw(H, W, size)
    sh = _nearest_matrix(H2, H)                        # (H2, H)
    swt = jnp.transpose(_nearest_matrix(W2, W))        # (W, W2)
    out = _resize_pallas(mask, (H2, W2), sh, swt, _nearest_threshold_kernel, jnp.float32)
    return out[0] if squeeze else out


# ----------------------------------------------------------------------------
# Module wrapper with the PyTorch forward semantics
# ----------------------------------------------------------------------------

class HumanResizeCropFinalV3:
    def __init__(self, size=512, crop_p=0.5):
        self.size = size
        self.crop_p = crop_p  # unused by this forward, kept for parity with the spec

    def __call__(self, img_dict, **kwargs):
        return self.forward(img_dict, **kwargs)

    def forward(self, img_dict, **kwargs):
        if isinstance(img_dict, dict):
            img = img_dict["image"]
            mask = img_dict.get("mask", None)
        else:
            img = img_dict
            mask = kwargs.get("mask", None)

        img = pallas_resize_bilinear(img, self.size)

        if mask is not None:
            if isinstance(mask, dict):
                processed = {}
                for token, token_mask in mask.items():
                    rm = pallas_resize_nearest_threshold(token_mask, self.size)
                    if float(jnp.sum(rm)) == 0.0:   # host-side structural decision
                        continue
                    # Values are exactly {0, 1} after thresholding, so the
                    # reference's `mask / mask.max()` is an identity here.
                    processed[token] = rm
                mask = processed if processed else None
            else:
                rm = pallas_resize_nearest_threshold(mask, self.size)
                if float(jnp.sum(rm)) == 0.0:
                    mask = None
                else:
                    mask = rm  # division by max (==1) is an identity

        kwargs["mask"] = mask
        if isinstance(img_dict, dict):
            img_dict["image"] = img
            img_dict["mask"] = mask
            return img_dict
        return img


# ----------------------------------------------------------------------------
# Pure numpy/JAX references (independent gather-based paths)
# ----------------------------------------------------------------------------

def _ref_resize_bilinear(img, size):
    x = np.asarray(img, dtype=np.float64)
    C, H, W = x.shape
    H2, W2 = _resized_hw(H, W, size)

    def coords(out_len, in_len):
        scale = in_len / out_len
        src = np.clip((np.arange(out_len) + 0.5) * scale - 0.5, 0.0, in_len - 1)
        lo = np.floor(src).astype(np.int64)
        hi = np.minimum(lo + 1, in_len - 1)
        return lo, hi, src - lo

    ylo, yhi, yf = coords(H2, H)
    xlo, xhi, xf = coords(W2, W)
    top = x[:, ylo][:, :, xlo] * (1 - xf) + x[:, ylo][:, :, xhi] * xf
    bot = x[:, yhi][:, :, xlo] * (1 - xf) + x[:, yhi][:, :, xhi] * xf
    out = top * (1 - yf)[None, :, None] + bot * yf[None, :, None]
    return jnp.asarray(out, dtype=img.dtype)


def _ref_resize_nearest_threshold(mask, size):
    m = np.asarray(mask, dtype=np.float64)
    C, H, W = m.shape
    H2, W2 = _resized_hw(H, W, size)
    ys = np.minimum((np.arange(H2) * H) // H2, H - 1)
    xs = np.minimum((np.arange(W2) * W) // W2, W - 1)
    r = m[:, ys][:, :, xs]
    return jnp.asarray((r > 0.5).astype(np.float32))


# ----------------------------------------------------------------------------
# Demo / self-test
# ----------------------------------------------------------------------------

if __name__ == "__main__":
    key = jax.random.PRNGKey(0)
    k_img, k_mask = jax.random.split(key)

    C, H, W = 3, 16, 24
    size = 32  # smaller edge (H=16) -> 32, W -> 48

    img = jax.random.uniform(k_img, (C, H, W), dtype=jnp.float32)
    mask = (jax.random.uniform(k_mask, (1, H, W)) > 0.4).astype(jnp.float32)

    tfm = HumanResizeCropFinalV3(size=size, crop_p=0.5)

    # --- dict input with a plain tensor mask --------------------------------
    out = tfm({"image": img, "mask": mask}, prompt="a photo of a person")
    out_img = jax.block_until_ready(out["image"])
    out_mask = jax.block_until_ready(out["mask"])

    H2, W2 = _resized_hw(H, W, size)
    assert out_img.shape == (C, H2, W2) and out_img.dtype == img.dtype
    assert out_mask.shape == (1, H2, W2) and out_mask.dtype == jnp.float32

    ref_img = _ref_resize_bilinear(img, size)
    ref_mask = _ref_resize_nearest_threshold(mask, size)
    assert jnp.allclose(out_img, ref_img, atol=1e-5, rtol=1e-5)
    assert jnp.allclose(out_mask, ref_mask)

    # --- dict input with per-token mask dict (all-zero token gets dropped) --
    zero_mask = jnp.zeros((1, H, W), dtype=jnp.float32)
    out2 = tfm({"image": img, "mask": {"tok_a": mask, "tok_b": zero_mask}})
    assert set(out2["mask"].keys()) == {"tok_a"}
    assert jnp.allclose(jax.block_until_ready(out2["mask"]["tok_a"]), ref_mask)

    print("KERNEL_OK")
</pallas_src>

<mosaic_0001>
module attributes {stable_mosaic.version = 11 : i64} {
  func.func @_bilinear_resize_kernel(%arg0: i32, %arg1: memref<32x16xf32, #tpu.memory_space<vmem>>, %arg2: memref<24x48xf32, #tpu.memory_space<vmem>>, %arg3: memref<1x16x24xf32, #tpu.memory_space<vmem>>, %arg4: memref<1x32x48xf32, #tpu.memory_space<vmem>>) attributes {dimension_semantics = [#tpu.dimension_semantics<parallel>], iteration_bounds = array<i64: 3>, scalar_prefetch = 0 : i64, scratch_operands = 0 : i64, tpu.core_type = #tpu.core_type<tc>, window_params = [{pipeline_mode = #tpu.pipeline_mode<synchronous>, transform_indices = @transform_0, window_bounds = array<i64: 32, 16>}, {pipeline_mode = #tpu.pipeline_mode<synchronous>, transform_indices = @transform_1, window_bounds = array<i64: 24, 48>}, {transform_indices = @transform_2, window_bounds = array<i64: 1, 16, 24>}, {transform_indices = @transform_3, window_bounds = array<i64: 1, 32, 48>}]} {
    %c0 = arith.constant 0 : index
    %c0_0 = arith.constant 0 : index
    %c0_1 = arith.constant 0 : index
    %0 = vector.load %arg3[%c0, %c0_0, %c0_1] : memref<1x16x24xf32, #tpu.memory_space<vmem>>, vector<1x16x24xf32>
    %1 = vector.shape_cast %0 : vector<1x16x24xf32> to vector<16x24xf32>
    %c0_2 = arith.constant 0 : index
    %c0_3 = arith.constant 0 : index
    %2 = vector.load %arg1[%c0_2, %c0_3] : memref<32x16xf32, #tpu.memory_space<vmem>>, vector<32x16xf32>
    %cst = arith.constant dense<0.000000e+00> : vector<32x24xf32>
    %3 = tpu.matmul %2, %1, %cst {dimension_numbers = #tpu.dot_dimension_numbers<[1], [0], [0], [1], [0, 0, 1, 1], [], []>} : vector<32x16xf32>, vector<16x24xf32>, vector<32x24xf32> -> vector<32x24xf32>
    %c0_4 = arith.constant 0 : index
    %c0_5 = arith.constant 0 : index
    %4 = vector.load %arg2[%c0_4, %c0_5] : memref<24x48xf32, #tpu.memory_space<vmem>>, vector<24x48xf32>
    %cst_6 = arith.constant dense<0.000000e+00> : vector<32x48xf32>
    %5 = tpu.matmul %3, %4, %cst_6 {dimension_numbers = #tpu.dot_dimension_numbers<[1], [0], [0], [1], [0, 0, 1, 1], [], []>} : vector<32x24xf32>, vector<24x48xf32>, vector<32x48xf32> -> vector<32x48xf32>
    %c0_7 = arith.constant 0 : index
    %c0_8 = arith.constant 0 : index
    %c0_9 = arith.constant 0 : index
    %6 = vector.load %arg4[%c0_7, %c0_8, %c0_9] : memref<1x32x48xf32, #tpu.memory_space<vmem>>, vector<1x32x48xf32>
    %7 = vector.shape_cast %6 : vector<1x32x48xf32> to vector<32x48xf32>
    %8 = vector.shape_cast %5 : vector<32x48xf32> to vector<1x32x48xf32>
    tpu.vector_store %arg4[%c0_7, %c0_8, %c0_9], %8 {strides = array<i32>} : memref<1x32x48xf32, #tpu.memory_space<vmem>>, vector<1x32x48xf32>,
    return
  }
  func.func @transform_0(%arg0: i32) -> (i32, i32) {
    %c0_i32 = arith.constant 0 : i32
    %c0_i32_0 = arith.constant 0 : i32
    %c0_i32_1 = arith.constant 0 : i32
    return %c0_i32, %c0_i32_0 : i32, i32
  }
  func.func @transform_1(%arg0: i32) -> (i32, i32) {
    %c0_i32 = arith.constant 0 : i32
    %c0_i32_0 = arith.constant 0 : i32
    %c0_i32_1 = arith.constant 0 : i32
    return %c0_i32, %c0_i32_0 : i32, i32
  }
  func.func @transform_2(%arg0: i32) -> (i32, i32, i32) {
    %c0_i32 = arith.constant 0 : i32
    %c0_i32_0 = arith.constant 0 : i32
    %c0_i32_1 = arith.constant 0 : i32
    return %arg0, %c0_i32, %c0_i32_0 : i32, i32, i32
  }
  func.func @transform_3(%arg0: i32) -> (i32, i32, i32) {
    %c0_i32 = arith.constant 0 : i32
    %c0_i32_0 = arith.constant 0 : i32
    %c0_i32_1 = arith.constant 0 : i32
    return %arg0, %c0_i32, %c0_i32_0 : i32, i32, i32
  }
}

</mosaic_0001>

<bundles_post_ra>
// kernel: tpu_custom_call.1
= control target key start
LH: loop header
LB: loop body
LE: loop exit
PB: predicated region body
PF: predicated region fallthrough
CT: control target
= control target key end

     0   :  { %8 = vsyncpa [#allocation3], 0  ;;  %s687_s0 = inlined_call_operand.vmem [shape: f32[32,16], index: 0, kind: input, shape index: {}]   ;;  %s688_s1 = inlined_call_operand.hbm [shape: f32[24,48], index: 1, kind: input, shape index: {}]   ;;  %s689_s2 = inlined_call_operand.vmem [shape: f32[3,16,24], index: 2, kind: input, shape index: {}]   ;;  %s690_s3 = inlined_call_operand.hbm [shape: f32[3,32,48], index: 3, kind: output, shape index: {}]  }
   0x1   :  { %9 = vsyncpa [#allocation4], 0 }
   0x2   :  { %11 = vsyncpa [#allocation4 + $0x1], 0  ;;  %s580_s12 = smov 0   ;;  %s582_s13 = smov 0  }
   0x3   :  { %s584_s14 = smov 0   ;;  %s586_s15 = smov 0  }
   0x4 LB: > { %s601_s16 = sadd.s32 4294967295, %s553_s15   ;;  %s374_s17 = sadd.s32 4294967294, %s553_s15   ;;  %s553_s15 = sphi %s586_s15, %s696_s15   ;;  %s549_s14 = sphi %s584_s14, %s695_s14   ;;  %s545_s13 = sphi %s582_s13, %s694_s13   ;;  %s541_s12 = sphi %s580_s12, %s693_s12  }
   0x5   : > { %s605_s18 = sadd.s32 1, %s553_s15   ;;  %s92_s19 = sadd.s32 1, %s549_s14 }
   0x6   : > { %s89_s20 = ssub.s32 %s553_s15, %s605_s18  ;;  %p102_p0 = scmp.ne.s32.totalorder %s549_s14, %s545_s13 }
   0x7   : > { %p90_p1 = scmp.eq.s32.totalorder %s89_s20, 0  ;;  %p103_p2 = scmp.eq.s32.totalorder %s601_s16, 2 }
   0x8   : > { %p108_p3 = scmp.ne.s32.totalorder %s545_s13, %s541_s12  ;;  %p109_p4 = scmp.eq.s32.totalorder %s374_s17, 2 }
   0x9   : > { %s616_s21 = scalar_select %p90_p1, %s549_s14, %s92_s19  }
   0xa   : > { %p618_p5 = por %p103_p2, %p102_p0  ;;  %p622_p6 = por %p109_p4, %p108_p3 }
   0xb   : > { %p375_p7 = scmp.ge.s32.totalorder %s553_s15, 1  ;;  %p116_p8 = scmp.lt.s32.totalorder %s553_s15, 4 }
   0xc   : > { %p417_p9 = scmp.eq.s32.totalorder %s601_s16, 0  ;;  %s130_s26 = sshll.u32 %s688_s1, 4  ;;  %s131_s26 = int_to_ptr.hbm [resolvable:$true] %s130_s26 }
   0xd   : > { %p117_p10 = pnand %p375_p7, %p116_p8  ;;  %s555_s27 = smov [#allocation2]  }
   0xe   : > { %s132_s28 = sshll.u32 %s555_s27, 4  ;;  %s556_s29 = smov 128   ;;  %s133_s28 = int_to_ptr.vmem [resolvable:$true] %s132_s28 }
   0xf   : > { %p409_p11 = pneg %p117_p10  ;;  %s557_s30 = smov 8  }
  0x10   : > { %156 = sbr.rel (%p117_p10) target bundleno = 316 (0x13c), region = 32 }
  0x11   : > { %p410_p12 = pnand %p417_p9, %p409_p11 }
  0x13   : > { %412 = dma.hbm_to_vmem [thread:$0]  (!%p410_p12), %s131_s26, 384, %s133_s28, [#allocation3], %s556_s29, %s556_s29, %s557_s30  }
  0x15   : > { %532 = dma.done.wait (%p417_p9), [#allocation3], 384  }
  0x16   : > { %534 = vsyncadd (%p417_p9), [#allocation3], 4294966912  ;;  %p181_p13 = scmp.lt.s32.totalorder %s601_s16, 2  ;;  %v188_v2 = vld [vmem:[%s687_s0] sm:$0xff]  ;;  %vm192_vm0 = vcmask 130048   ;;  %v189_v3 = vld [vmem:[%s687_s0 + $0x8] sm:$0xff] }
  0x17   : > { %v236_v4 = vld [vmem:[#allocation2 + $0x10] sm:$0xff]  ;;  %v235_v5 = vld [vmem:[#allocation2 + $0x8] sm:$0xff]  ;;  %v191_v7 = vld [vmem:[%s687_s0 + $0x18] sm:$0xff]  ;;  %vm237_vm1 = vcmask 195584   ;;  %s178_s26 = sand.u32 1, %s545_s13   ;;  %vm279_vm2 = vcmask 392192  }
  0x18   : > { %s182_s4 = scalar_select %p181_p13, %s601_s16, 2  ;;  %263 = vmatpush.msra.mxu1 %v236_v4  ;;  %400 = vmatpush.msra.mxu2 %v236_v4  ;;  %v190_v6 = vld [vmem:[%s687_s0 + $0x10] sm:$0xff]  ;;  %v234_v8 = vld [vmem:[#allocation2] sm:$0xff] }
  0x19   : > { %s380_s27 = sshll.u32 %s178_s26, 5  ;;  %s397_s29 = sshll.u32 %s601_s16, 5 }
  0x1a   : > { %s396_s5 = sshll.u32 %s182_s4, 4  ;;  %264 = vmatpush.msra.mxu1 %v235_v5  ;;  %401 = vmatpush.msra.mxu2 %v235_v5  ;;  %s180_s28 = scalar_lea.vmem [#allocation5], %s380_s27 }
  0x1b   : > { %s185_s8 = scalar_lea.vmem %s689_s2, %s396_s5  ;;  %s296_s5 = scalar_lea.hbm %s690_s3, %s397_s29 }
  0x1c   : > { %v187_v0 = vld [vmem:[%s185_s8 + $0x8] sm:$0xff]  ;;  %v186_v1 = vld [vmem:[%s185_s8] sm:$0xff]  ;;  %265 = vmatpush.msra.mxu1 %v234_v8  ;;  %402 = vmatpush.msra.mxu2 %v234_v8  ;;  %s297_s6 = sshll.u32 %s180_s28, 4  ;;  %s299_s7 = sshll.u32 %s296_s5, 4  ;;  %s298_s6 = int_to_ptr.vmem [resolvable:$true] %s297_s6  ;;  %s300_s7 = int_to_ptr.hbm [resolvable:$true] %s299_s7 }
  0x1d   : > { %219 = vmatpush.msra.mxu0 %v187_v0  ;;  %398 = vmatpush.msra.mxu3 %v187_v0  ;;  %s285_s8 = scalar_lea.sflag [#allocation4], %s178_s26  ;;  %s501_s9 = sshra.s32 %s300_s7, 4  ;;  %s502_s9 = int_to_ptr.hbm [resolvable:$true] %s501_s9 }
  0x1e   : > { %s503_s10 = scalar_lea.hbm %s502_s9, 32  ;;  %s507_s17 = scalar_lea.hbm %s690_s3, 96 }
  0x1f   : > { %220 = vmatpush.msra.mxu0 %v186_v1  ;;  %399 = vmatpush.msra.mxu3 %v186_v1  ;;  %p504_p0 = scmp.ne.s32.totalorder %s502_s9, %s503_s10  ;;  %p508_p3 = scmp.lt.s32.totalorder %s502_s9, %s690_s3 }
  0x20   : > { %383 = vmatmul.msk.f32.vlgmr.msra.gmra.mxu0 %vm192_vm0, %v188_v2  ;;  %384 = vmatmul.msk.f32.vlgmr.msra.gmra.mxu3 %vm192_vm0, %v189_v3  ;;  %p509_p4 = scmp.lt.s32.totalorder %s507_s17, %s503_s10 }
  0x21   : > { %p505_p1 = pnand %p504_p0, %p618_p5 }
  0x22   : > { %p510_p7 = por %p509_p4, %p508_p3 }
  0x23   : > { %p506_p2 = pneg %p505_p1 }
  0x25   : > { %p511_p8 = pnand %p510_p7, %p506_p2 }
  0x28   : > { %385 = vmatmul.msk.f32.gmra.mxu3 %vm192_vm0, %v190_v6 }
  0x30   : > { %386 = vmatmul.msk.f32.gmra.mxu3 %vm192_vm0, %v191_v7 }
  0x9d   : > { %v222_v9 = vpop.f32.mrf.mxu0 }
  0x9e   : > { %387 = vmatmul.msk.f32.vlgmr.msra.gmra.mxu1 %vm237_vm1, %v222_v9 }
  0xa3   : > { %v225_v10 = vpop.f32.mrf.mxu3 }
  0xa6   : > { %388 = vmatmul.msk.f32.gmra.mxu1 %vm237_vm1, %v225_v10 }
  0xab   : > { %v228_v11 = vpop.f32.mrf.mxu3 }
  0xac   : > { %389 = vmatmul.msk.f32.vlgmr.msra.gmra.mxu2 %vm237_vm1, %v228_v11 }
  0xb3   : > { %v231_v12 = vpop.f32.mrf.mxu3 }
  0xb4   : > { %390 = vmatmul.msk.f32.gmra.mxu2 %vm237_vm1, %v231_v12 }
 0x11b   : > { %v267_v13 = vpop.f32.mrf.mxu1 }
 0x11c   : > { %280 = vst.msk [vmem:[%s180_s28] sm:$0xff] %vm279_vm2, %v267_v13 }
 0x123   : > { %v270_v14 = vpop.f32.mrf.mxu1 }
 0x124   : > { %281 = vst.msk [vmem:[%s180_s28 + $0x8] sm:$0xff] %vm279_vm2, %v270_v14 }
 0x12f   : > { %v273_v15 = vpop.f32.mrf.mxu2 }
 0x130   : > { %282 = vst.msk [vmem:[%s180_s28 + $0x10] sm:$0xff] %vm279_vm2, %v273_v15 }
 0x137   : > { %v276_v16 = vpop.f32.mrf.mxu2 }
 0x138   : > { %283 = vst.msk [vmem:[%s180_s28 + $0x18] sm:$0xff] %vm279_vm2, %v276_v16 }
 0x139   : > { %514 = shalt.err (!%p511_p8)
}
 0x13a   : > { %s558_s24 = smov 128   ;;  %s559_s25 = smov 8  }
 0x13b   : > { %407 = dma.vmem_to_hbm [thread:$0]  (%p618_p5), %s298_s6, 512, %s300_s7, %s285_s8, %s558_s24, %s558_s24, %s559_s25  }
 0x13c PF: > { %p419_p9 = scmp.ge.s32.totalorder %s553_s15, 2  ;;  %s314_s26 = sand.u32 1, %s541_s12  }
 0x13d   : > { %s315_s27 = scalar_lea.sflag [#allocation4], %s314_s26 }
 0x13e   : > { %p414_p10 = pnand %p419_p9, %p622_p6 }
 0x140   : > { %p415_p11 = pneg %p414_p10 }
 0x142   : > { %536 = dma.done.wait (%p415_p11), %s315_s27, 512  }
 0x143   : > { %538 = vsyncadd (%p415_p11), %s315_s27, 4294966784  ;;  %p14_p12 = scmp.ge.s32.totalorder %s605_s18, 5   ;;  %s693_s12 = smov %s545_s13 }
 0x144   : > { %s694_s13 = smov %s549_s14  ;;  %s695_s14 = smov %s616_s21 }
 0x145   : > { %s696_s15 = smov %s605_s18  ;;  %16 = sbr.rel (!%p14_p12) target bundleno = 4 (0x4), region = 72 }
 0x14a   :  { %321 = vsyncpa [#allocation3], 1 }
 0x14b   :  { %323 = vsyncpa [#allocation3 + $0x1], 1 }
 0x14c   :  { %324 = vsyncpa [#allocation4], 1 }
 0x14d   :  { %326 = vsyncpa [#allocation4 + $0x1], 1 }

</bundles_post_ra>
